<compile_context>
chip_gen: v7x
topology: tpu7x:2x2x1
jax: 0.10.0
libtpu: 0.0.40
codegen_flags: <defaults>
</compile_context>

<pallas_src>
import jax
import jax.numpy as jnp
from jax import lax
from jax.experimental import pallas as pl
from jax.experimental.pallas import tpu as pltpu


def _round_up(n, m):
    return ((n + m - 1) // m) * m


def fcn2_kernel(x_ref, w1t_ref, b1_ref, w2t_ref, b2_ref, w3_ref, b3_ref, o_ref):
    # Linear1 + ReLU  (MXU matmul, f32 accumulate)
    h1 = jnp.dot(x_ref[...], w1t_ref[...], preferred_element_type=jnp.float32)
    h1 = jnp.maximum(h1 + b1_ref[...], 0.0)
    # Dropout (eval mode) = identity
    # Linear2 + ReLU
    h2 = jnp.dot(h1, w2t_ref[...], preferred_element_type=jnp.float32)
    h2 = jnp.maximum(h2 + b2_ref[...], 0.0)
    # Linear3, computed transposed: out[o, b] = sum_c W3[o, c] * h2[b, c]
    # -> [n_out, tile_b] so the store is lane-dense (last dim = tile_b).
    out = lax.dot_general(
        w3_ref[...], h2,
        dimension_numbers=(((1,), (1,)), ((), ())),
        preferred_element_type=jnp.float32)
    o_ref[...] = (out + b3_ref[...]).astype(o_ref.dtype)


def fcn2_forward(x, params, *, tile_b=1024):
    """x: [B, n_input] float32 -> [B, 2] float32 (eval-mode forward)."""
    B, n_input = x.shape

    w1t = params["w1"].T                      # [n_input, H1]
    H1 = w1t.shape[1]
    b1 = params["b1"][None, :]                # [1, H1]
    w2t = params["w2"].T                      # [H1, H2]
    H2 = w2t.shape[1]
    b2 = params["b2"][None, :]                # [1, H2]
    w3 = params["w3"]                         # [n_out, H2] (NOT transposed)
    n_out = w3.shape[0]
    b3 = params["b3"][:, None]                # [n_out, 1]

    # Tile selection + batch padding (no divisibility requirement on B).
    if B <= tile_b:
        B_pad = _round_up(B, 8)               # sublane alignment, single tile
        tile = B_pad
    else:
        tile = _round_up(tile_b, 128)         # lane-dense out blocks need x128
        B_pad = _round_up(B, tile)
    if B_pad != B:
        x = jnp.pad(x, ((0, B_pad - B), (0, 0)))

    grid = (B_pad // tile,)

    out_t = pl.pallas_call(
        fcn2_kernel,
        out_shape=jax.ShapeDtypeStruct((n_out, B_pad), jnp.float32),
        grid_spec=pltpu.PrefetchScalarGridSpec(
            num_scalar_prefetch=0,
            grid=grid,
            in_specs=[
                pl.BlockSpec((tile, n_input), lambda i: (i, 0)),   # x tile
                pl.BlockSpec((n_input, H1), lambda i: (0, 0)),     # W1^T
                pl.BlockSpec((1, H1), lambda i: (0, 0)),           # b1
                pl.BlockSpec((H1, H2), lambda i: (0, 0)),          # W2^T
                pl.BlockSpec((1, H2), lambda i: (0, 0)),           # b2
                pl.BlockSpec((n_out, H2), lambda i: (0, 0)),       # W3
                pl.BlockSpec((n_out, 1), lambda i: (0, 0)),        # b3
            ],
            out_specs=pl.BlockSpec((n_out, tile), lambda i: (0, i)),
        ),
        compiler_params=pltpu.CompilerParams(
            dimension_semantics=("parallel",)),
    )(x, w1t, b1, w2t, b2, w3, b3)

    # Back to PyTorch layout [B, n_out]; drop padded rows.
    return out_t.T[:B]


def init_params(key, n_input, n_hidden):
    """Deterministic init mimicking nn.Linear default U(-1/sqrt(fan_in), ...)."""
    h1, h2 = n_hidden
    k = jax.random.split(key, 6)
    l1 = 1.0 / jnp.sqrt(n_input)
    l2 = 1.0 / jnp.sqrt(h1)
    l3 = 1.0 / jnp.sqrt(h2)
    return {
        "w1": jax.random.uniform(k[0], (h1, n_input), jnp.float32, -l1, l1),
        "b1": jax.random.uniform(k[1], (h1,), jnp.float32, -l1, l1),
        "w2": jax.random.uniform(k[2], (h2, h1), jnp.float32, -l2, l2),
        "b2": jax.random.uniform(k[3], (h2,), jnp.float32, -l2, l2),
        "w3": jax.random.uniform(k[4], (2, h2), jnp.float32, -l3, l3),
        "b3": jax.random.uniform(k[5], (2,), jnp.float32, -l3, l3),
    }


def fcn2_ref(x, params):
    """Pure-JAX reference (eval-mode forward)."""
    h1 = jnp.maximum(x @ params["w1"].T + params["b1"], 0.0)
    h2 = jnp.maximum(h1 @ params["w2"].T + params["b2"], 0.0)
    return h2 @ params["w3"].T + params["b3"]


if __name__ == "__main__":
    B, n_input, n_hidden = 16, 32, (64, 32)
    key = jax.random.PRNGKey(0)
    kx, kp = jax.random.split(key)
    x = jax.random.normal(kx, (B, n_input), jnp.float32)
    params = init_params(kp, n_input, n_hidden)

    out = fcn2_forward(x, params)
    out = jax.block_until_ready(out)

    ref = fcn2_ref(x, params)
    assert out.shape == (B, 2), out.shape
    assert jnp.allclose(out, ref, atol=1e-4, rtol=1e-4), "mismatch vs reference"
    print("KERNEL_OK")
</pallas_src>

<mosaic_0001>
module attributes {stable_mosaic.version = 11 : i64} {
  func.func @fcn2_kernel(%arg0: i32, %arg1: memref<16x32xf32, #tpu.memory_space<vmem>>, %arg2: memref<32x64xf32, #tpu.memory_space<vmem>>, %arg3: memref<1x64xf32, #tpu.memory_space<vmem>>, %arg4: memref<64x32xf32, #tpu.memory_space<vmem>>, %arg5: memref<1x32xf32, #tpu.memory_space<vmem>>, %arg6: memref<2x32xf32, #tpu.memory_space<vmem>>, %arg7: memref<2x1xf32, #tpu.memory_space<vmem>>, %arg8: memref<2x16xf32, #tpu.memory_space<vmem>>) attributes {dimension_semantics = [#tpu.dimension_semantics<parallel>], iteration_bounds = array<i64: 1>, scalar_prefetch = 0 : i64, scratch_operands = 0 : i64, tpu.core_type = #tpu.core_type<tc>, window_params = [{transform_indices = @transform_0, window_bounds = array<i64: 16, 32>}, {pipeline_mode = #tpu.pipeline_mode<synchronous>, transform_indices = @transform_1, window_bounds = array<i64: 32, 64>}, {pipeline_mode = #tpu.pipeline_mode<synchronous>, transform_indices = @transform_2, window_bounds = array<i64: 1, 64>}, {pipeline_mode = #tpu.pipeline_mode<synchronous>, transform_indices = @transform_3, window_bounds = array<i64: 64, 32>}, {pipeline_mode = #tpu.pipeline_mode<synchronous>, transform_indices = @transform_4, window_bounds = array<i64: 1, 32>}, {pipeline_mode = #tpu.pipeline_mode<synchronous>, transform_indices = @transform_5, window_bounds = array<i64: 2, 32>}, {pipeline_mode = #tpu.pipeline_mode<synchronous>, transform_indices = @transform_6, window_bounds = array<i64: 2, 1>}, {transform_indices = @transform_7, window_bounds = array<i64: 2, 16>}]} {
    %c0 = arith.constant 0 : index
    %c0_0 = arith.constant 0 : index
    %0 = vector.load %arg1[%c0, %c0_0] : memref<16x32xf32, #tpu.memory_space<vmem>>, vector<16x32xf32>
    %c0_1 = arith.constant 0 : index
    %c0_2 = arith.constant 0 : index
    %1 = vector.load %arg2[%c0_1, %c0_2] : memref<32x64xf32, #tpu.memory_space<vmem>>, vector<32x64xf32>
    %cst = arith.constant dense<0.000000e+00> : vector<16x64xf32>
    %2 = tpu.matmul %0, %1, %cst {dimension_numbers = #tpu.dot_dimension_numbers<[1], [0], [0], [1], [0, 0, 1, 1], [], []>} : vector<16x32xf32>, vector<32x64xf32>, vector<16x64xf32> -> vector<16x64xf32>
    %c0_3 = arith.constant 0 : index
    %c0_4 = arith.constant 0 : index
    %3 = vector.load %arg3[%c0_3, %c0_4] : memref<1x64xf32, #tpu.memory_space<vmem>>, vector<1x64xf32>
    %4 = vector.broadcast %3 : vector<1x64xf32> to vector<16x64xf32>
    %5 = arith.addf %2, %4 : vector<16x64xf32>
    %cst_5 = arith.constant 0.000000e+00 : f32
    %6 = vector.broadcast %cst_5 : f32 to vector<16x64xf32>
    %7 = arith.maximumf %5, %6 : vector<16x64xf32>
    %c0_6 = arith.constant 0 : index
    %c0_7 = arith.constant 0 : index
    %8 = vector.load %arg4[%c0_6, %c0_7] : memref<64x32xf32, #tpu.memory_space<vmem>>, vector<64x32xf32>
    %cst_8 = arith.constant dense<0.000000e+00> : vector<16x32xf32>
    %9 = tpu.matmul %7, %8, %cst_8 {dimension_numbers = #tpu.dot_dimension_numbers<[1], [0], [0], [1], [0, 0, 1, 1], [], []>} : vector<16x64xf32>, vector<64x32xf32>, vector<16x32xf32> -> vector<16x32xf32>
    %c0_9 = arith.constant 0 : index
    %c0_10 = arith.constant 0 : index
    %10 = vector.load %arg5[%c0_9, %c0_10] : memref<1x32xf32, #tpu.memory_space<vmem>>, vector<1x32xf32>
    %11 = vector.broadcast %10 : vector<1x32xf32> to vector<16x32xf32>
    %12 = arith.addf %9, %11 : vector<16x32xf32>
    %cst_11 = arith.constant 0.000000e+00 : f32
    %13 = vector.broadcast %cst_11 : f32 to vector<16x32xf32>
    %14 = arith.maximumf %12, %13 : vector<16x32xf32>
    %c0_12 = arith.constant 0 : index
    %c0_13 = arith.constant 0 : index
    %15 = vector.load %arg6[%c0_12, %c0_13] : memref<2x32xf32, #tpu.memory_space<vmem>>, vector<2x32xf32>
    %cst_14 = arith.constant dense<0.000000e+00> : vector<2x16xf32>
    %16 = tpu.matmul %15, %14, %cst_14 {dimension_numbers = #tpu.dot_dimension_numbers<[1], [1], [0], [0], [0, 0, 1, 0], [], []>} : vector<2x32xf32>, vector<16x32xf32>, vector<2x16xf32> -> vector<2x16xf32>
    %c0_15 = arith.constant 0 : index
    %c0_16 = arith.constant 0 : index
    %17 = vector.load %arg7[%c0_15, %c0_16] : memref<2x1xf32, #tpu.memory_space<vmem>>, vector<2x1xf32>
    %18 = vector.broadcast %17 : vector<2x1xf32> to vector<2x16xf32>
    %19 = arith.addf %16, %18 : vector<2x16xf32>
    %c0_17 = arith.constant 0 : index
    %c0_18 = arith.constant 0 : index
    %20 = vector.load %arg8[%c0_17, %c0_18] : memref<2x16xf32, #tpu.memory_space<vmem>>, vector<2x16xf32>
    tpu.vector_store %arg8[%c0_17, %c0_18], %19 {strides = array<i32>} : memref<2x16xf32, #tpu.memory_space<vmem>>, vector<2x16xf32>,
    return
  }
  func.func @transform_0(%arg0: i32) -> (i32, i32) {
    %c0_i32 = arith.constant 0 : i32
    %c0_i32_0 = arith.constant 0 : i32
    return %arg0, %c0_i32 : i32, i32
  }
  func.func @transform_1(%arg0: i32) -> (i32, i32) {
    %c0_i32 = arith.constant 0 : i32
    %c0_i32_0 = arith.constant 0 : i32
    %c0_i32_1 = arith.constant 0 : i32
    return %c0_i32, %c0_i32_0 : i32, i32
  }
  func.func @transform_2(%arg0: i32) -> (i32, i32) {
    %c0_i32 = arith.constant 0 : i32
    %c0_i32_0 = arith.constant 0 : i32
    %c0_i32_1 = arith.constant 0 : i32
    return %c0_i32, %c0_i32_0 : i32, i32
  }
  func.func @transform_3(%arg0: i32) -> (i32, i32) {
    %c0_i32 = arith.constant 0 : i32
    %c0_i32_0 = arith.constant 0 : i32
    %c0_i32_1 = arith.constant 0 : i32
    return %c0_i32, %c0_i32_0 : i32, i32
  }
  func.func @transform_4(%arg0: i32) -> (i32, i32) {
    %c0_i32 = arith.constant 0 : i32
    %c0_i32_0 = arith.constant 0 : i32
    %c0_i32_1 = arith.constant 0 : i32
    return %c0_i32, %c0_i32_0 : i32, i32
  }
  func.func @transform_5(%arg0: i32) -> (i32, i32) {
    %c0_i32 = arith.constant 0 : i32
    %c0_i32_0 = arith.constant 0 : i32
    %c0_i32_1 = arith.constant 0 : i32
    return %c0_i32, %c0_i32_0 : i32, i32
  }
  func.func @transform_6(%arg0: i32) -> (i32, i32) {
    %c0_i32 = arith.constant 0 : i32
    %c0_i32_0 = arith.constant 0 : i32
    %c0_i32_1 = arith.constant 0 : i32
    return %c0_i32, %c0_i32_0 : i32, i32
  }
  func.func @transform_7(%arg0: i32) -> (i32, i32) {
    %c0_i32 = arith.constant 0 : i32
    %c0_i32_0 = arith.constant 0 : i32
    return %c0_i32, %arg0 : i32, i32
  }
}

</mosaic_0001>

<bundles_post_ra>
// kernel: tpu_custom_call.1
= control target key start
LH: loop header
LB: loop body
LE: loop exit
PB: predicated region body
PF: predicated region fallthrough
CT: control target
= control target key end

     0   :  { %vm40_vm0 = vcmask 261120   ;;  %s564_s0 = inlined_call_operand.vmem [shape: f32[16,32], index: 0, kind: input, shape index: {}]   ;;  %s565_s1 = inlined_call_operand.vmem [shape: f32[32,64], index: 1, kind: input, shape index: {}]   ;;  %s566_s2 = inlined_call_operand.vmem [shape: f32[1,64], index: 2, kind: input, shape index: {}]   ;;  %s567_s3 = inlined_call_operand.vmem [shape: f32[64,32], index: 3, kind: input, shape index: {}]   ;;  %s568_s4 = inlined_call_operand.vmem [shape: f32[1,32], index: 4, kind: input, shape index: {}]   ;;  %s569_s5 = inlined_call_operand.vmem [shape: f32[2,32], index: 5, kind: input, shape index: {}]   ;;  %s570_s6 = inlined_call_operand.vmem [shape: f32[2,1], index: 6, kind: input, shape index: {}]   ;;  %s571_s7 = inlined_call_operand.hbm [shape: f32[2,16], index: 7, kind: output, shape index: {}]  }
   0x1   :  { %v29_v0 = vld [vmem:[%s565_s1] sm:$0xff]  ;;  %v30_v1 = vld [vmem:[%s565_s1 + $0x8] sm:$0xff]  ;;  %v31_v2 = vld [vmem:[%s565_s1 + $0x10] sm:$0xff] }
   0x2   :  { %v390_v3 = vpack.c.bf16 %v30_v1, %v29_v0  ;;  %v32_v4 = vld [vmem:[%s565_s1 + $0x18] sm:$0xff]  ;;  %v27_v5 = vld [vmem:[%s564_s0] sm:$0xff]  ;;  %v125_v8 = vld [vmem:[%s567_s3 + $0x8] sm:$0xff] }
   0x3   :  { %v394_v6 = vpack.c.bf16 %v32_v4, %v31_v2  ;;  %361 = vmatprep.mubr.msk.f32.mxu0 %vm40_vm0, %v27_v5  ;;  %v124_v7 = vld [vmem:[%s567_s3] sm:$0xff]  ;;  %v126_v9 = vld [vmem:[%s567_s3 + $0x10] sm:$0xff]  ;;  %v127_v11 = vld [vmem:[%s567_s3 + $0x18] sm:$0xff] }
   0x4   :  { %391 = vmatprep.subr.bf16.mxu0 %v390_v3  ;;  %v398_v10 = vpack.c.bf16 %v125_v8, %v124_v7  ;;  %v402_v12 = vpack.c.bf16 %v127_v11, %v126_v9  ;;  %v128_v13 = vld [vmem:[%s567_s3 + $0x20] sm:$0xff]  ;;  %v129_v14 = vld [vmem:[%s567_s3 + $0x28] sm:$0xff] }
   0x5   :  { %393 = vmatpush3.bf16.msra.mxu0 %v390_v3 }
   0x6   :  { %12 = vsyncpa [#allocation3], 0  ;;  %395 = vmatprep.subr.bf16.mxu0 %v394_v6  ;;  %399 = vmatprep.subr.bf16.mxu1 %v398_v10  ;;  %v406_v15 = vpack.c.bf16 %v129_v14, %v128_v13  ;;  %v28_v16 = vld [vmem:[%s564_s0 + $0x8] sm:$0xff]  ;;  %v130_v17 = vld [vmem:[%s567_s3 + $0x30] sm:$0xff]  ;;  %vm139_vm1 = vcmask 523264   ;;  %v448_v27 = vmov 0.0|0.0  }
   0x7   :  { %401 = vmatpush3.bf16.msra.mxu1 %v398_v10  ;;  %v131_v18 = vld [vmem:[%s567_s3 + $0x38] sm:$0xff]  ;;  %v325_v20 = vld [vmem:[%s566_s2] ss:$0 sm:$0xff]  ;;  %vm449_vm2 = vmmov 0   ;;  %v450_v28 = vmov 0.0   ;;  %v451_v30 = vmov 0   ;;  %vm416_vm3 = vmpackc.low %vm40_vm0, %vm40_vm0 }
   0x8   :  { %403 = vmatprep.subr.bf16.mxu1 %v402_v12  ;;  %v410_v19 = vpack.c.bf16 %v131_v18, %v130_v17  ;;  %v224_v29 = vld [vmem:[%s570_s6] sm:$0x3]  ;;  %423 = vset.pattern.permute.xlu0 %v451_v30  ;;  %s452_s9 = smov [#allocation2]   ;;  %vm309_vm4 = vcmask 123904  }
   0x9   :  { %397 = vmatpush3.bf16.msra.mxu0 %v394_v6  ;;  %227 = vperm.xlu0 %423, %v224_v29   ;;  %v328_v31 = vld [vmem:[%s568_s4] ss:$0 sm:$0xff]  ;;  %s317_s4 = sshll.u32 %s452_s9, 4  ;;  %s318_s4 = int_to_ptr.vmem [resolvable:$true] %s317_s4 }
   0xa   :  { %414 = vmatprep.subr.bf16.mxu0 %v448_v27  ;;  %v223_v39 = vld [vmem:[%s569_s5] sm:$0x3]  ;;  %s424_s10 = scalar_lea.vmem %s318_s4, 32  ;;  %p429_p1 = scmp.lt.s32.totalorder %s318_s4, %s318_s4 }
   0xb   :  { %405 = vmatpush3.bf16.msra.mxu1 %v402_v12  ;;  %p425_p0 = scmp.ne.s32.totalorder %s318_s4, %s424_s10  ;;  %p430_p2 = scmp.lt.s32.totalorder %s424_s10, %s424_s10 }
   0xc   :  { %362 = vmatmul.mubr.msk.f32.vlgmr.msra.gmra.mrb[0].mxu0 %vm40_vm0, %v28_v16  ;;  %407 = vmatprep.subr.bf16.mxu1 %v406_v15 }
   0xd   :  { %387 = vmatprep.mubr.msk.f32.mxu0 %vm449_vm2, %v450_v28  ;;  %p431_p3 = por %p430_p2, %p429_p1 }
   0xf   :  { %409 = vmatpush3.bf16.msra.mxu1 %v406_v15  ;;  %p432_p4 = pnand %p431_p3, %p425_p0 }
  0x10   :  { %411 = vmatprep.subr.bf16.mxu1 %v410_v19 }
  0x13   :  { %413 = vmatpush3.bf16.msra.mxu1 %v410_v19 }
  0x88   :  { %v228_v40 = vpop.permute.xlu0 %227 }
  0xdf   :  { %v363_v21 = vpop.f32.mrb[0].mxu0 }
  0xe0   :  { %v119_v22 = vadd.f32 %v363_v21, %v325_v20  ;;  %v113_v23 = vpop.f32.mrb[1].mxu0 }
  0xe1   :  { %v114_v24 = vadd.f32 %v325_v20, %v113_v23 }
  0xe2   :  { %v123_v26 = vmax.f32 %v119_v22, 0.0 }
  0xe3   :  { %v122_v25 = vmax.f32 %v114_v24, 0.0 }
  0xe5   :  { %380 = vmatprep.mubr.msk.f32.mxu1 %vm139_vm1, %v122_v25 }
  0xe6   :  { %381 = vmatmul.mubr.msk.f32.vlgmr.msra.gmra.mrb[0].mxu1 %vm139_vm1, %v123_v26 }
 0x1b9   :  { %v382_v32 = vpop.f32.mrb[0].mxu1 }
 0x1ba   :  { %v218_v33 = vadd.f32 %v382_v32, %v328_v31  ;;  %v212_v34 = vpop.f32.mrb[1].mxu1 }
 0x1bb   :  { %v213_v35 = vadd.f32 %v328_v31, %v212_v34 }
 0x1bc   :  { %v222_v36 = vmax.f32 %v218_v33, 0.0 }
 0x1bd   :  { %v221_v37 = vmax.f32 %v213_v35, 0.0 }
 0x1bf   :  { %v415_v38 = vpack.c.bf16 %v222_v36, %v221_v37 }
 0x1c1   :  { %417 = vmatpush3.bf16.xpose.msk.msra.mxu0 %vm416_vm3, %v415_v38 }
 0x1c8   :  { %388 = vmatmul.mubr.msk.f32.vlgmr.msra.gmra.mrb[2].mxu0 %vm40_vm0, %v223_v39 }
 0x29b   :  { %v305_v41 = vpop.f32.mrb[2].mxu0 }
 0x29c   :  { %v306_v42 = vadd.f32 %v305_v41, %v228_v40  ;;  %v389_v43 = vpop.f32.mrb[3].mxu0 }
 0x29e   :  { %310 = vst.msk [vmem:[#allocation2] sm:$0x3] %vm309_vm4, %v306_v42 }
 0x29f   :  { %435 = shalt.err (!%p432_p4)
}
 0x2a0   :  { %s436_s12 = scalar_lea.hbm %s571_s7, 32 }
 0x2a1   :  { %p437_p5 = scmp.ne.s32.totalorder %s571_s7, %s436_s12  ;;  %p440_p6 = scmp.lt.u32.totalorder %s436_s12, %s571_s7 }
 0x2a3   :  { %p442_p7 = pnand %p440_p6, %p437_p5 }
 0x2a5   :  { %445 = shalt.err (!%p442_p7)
}
 0x2a6   :  { %320 = dma.vmem_to_hbm [thread:$0]  %s318_s4, 32, %s571_s7, [#allocation3]  }
 0x2a7   :  { %446 = dma.done.wait [#allocation3], 32  }
 0x2a8   :  { %447 = vsyncadd [#allocation3], 4294967264 }
 0x2a9   :  { %324 = vsyncpa [#allocation3], 1 }

</bundles_post_ra>
